<compile_context>
chip_gen: v5e
topology: v5e:2x2
jax: 0.10.0
libtpu: 0.0.40
codegen_flags: <defaults>
</compile_context>

<pallas_src>
import functools

import jax
import jax.numpy as jnp
from jax.experimental import pallas as pl
from jax.experimental.pallas import tpu as pltpu

LANE = 128           # vreg lane width; hidden dims padded to this
OUT_PAD = 8          # output padded only to 8 lanes (real outputs = 2)
H1, H2, OUT = 64, 32, 2


def _round_up(n, m):
    return ((n + m - 1) // m) * m


def _pad2d(a, rows, cols):
    return jnp.pad(a, ((0, rows - a.shape[0]), (0, cols - a.shape[1])))


def mlp_kernel(x_ref, w1_ref, b1_ref, w2_ref, b2_ref, w3_ref, b3_ref, o_ref):
    # Fused 3-layer MLP on one (tm, in_features) batch tile.
    # Matmuls hit the MXU with f32 accumulation; bias + ReLU run on the VPU in f32;
    # activations cast back to the weight dtype (bf16 or f32) for the next matmul.
    x = x_ref[...].astype(w1_ref.dtype)                       # in-kernel cast (VPU slack)
    h1 = jnp.dot(x, w1_ref[...], preferred_element_type=jnp.float32) + b1_ref[...]
    h1 = jnp.maximum(h1, 0.0).astype(w2_ref.dtype)
    h2 = jnp.dot(h1, w2_ref[...], preferred_element_type=jnp.float32) + b2_ref[...]
    h2 = jnp.maximum(h2, 0.0).astype(w3_ref.dtype)
    out = jnp.dot(h2, w3_ref[...], preferred_element_type=jnp.float32) + b3_ref[...]
    o_ref[...] = out.astype(o_ref.dtype)                      # narrow (tm, 8) store


@functools.partial(jax.jit, static_argnames=("tm", "use_bf16"))
def mlp_forward(x, w1, b1, w2, b2, w3, b3, *, tm=2048, use_bf16=True):
    batch, in_features = x.shape
    assert w1.shape == (in_features, H1) and w2.shape == (H1, H2) and w3.shape == (H2, OUT)

    compute_dtype = jnp.bfloat16 if use_bf16 else jnp.float32

    # ----- batch tiling (no HBM batch padding; ragged last tile) --------------
    batch_8 = _round_up(batch, 8)
    if batch_8 >= 16:
        # keep at least 2 grid steps so v7x's two TensorCores both get work,
        # while never exceeding the requested tm; tm stays a multiple of 8.
        tm = max(8, min(tm, _round_up(pl.cdiv(batch_8, 2), 8)))
    else:
        tm = 8
    grid = (pl.cdiv(batch, tm),)

    # ----- weights/biases: padded + VMEM-resident (tiny, one-time cast) -------
    # Zero padding keeps results exact: padded hidden columns stay exactly zero
    # through bias add (padded bias cols are 0) and ReLU; padded w3 rows/cols are 0.
    w1_p = _pad2d(w1, in_features, LANE).astype(compute_dtype)   # real K, padded N
    w2_p = _pad2d(w2, LANE, LANE).astype(compute_dtype)
    w3_p = _pad2d(w3, LANE, OUT_PAD).astype(compute_dtype)
    b1_p = _pad2d(b1, 1, LANE).astype(jnp.float32)
    b2_p = _pad2d(b2, 1, LANE).astype(jnp.float32)
    b3_p = _pad2d(b3, 1, OUT_PAD).astype(jnp.float32)

    # ----- advisory cost estimate: actual post-layout HBM traffic -------------
    x_item = jnp.dtype(x.dtype).itemsize
    w_item = jnp.dtype(compute_dtype).itemsize
    weight_bytes = ((in_features * LANE + LANE * LANE + LANE * OUT_PAD) * w_item
                    + (LANE + LANE + OUT_PAD) * 4)
    cost = pl.CostEstimate(
        flops=2 * batch * (in_features * H1 + H1 * H2 + H2 * OUT),
        transcendentals=0,
        bytes_accessed=(batch * in_features * x_item      # raw x read
                        + batch * OUT_PAD * 4             # narrow f32 output write
                        + weight_bytes),                  # resident weights/biases
    )

    # ----- VMEM budget: actual need + headroom (not the whole v7x VMEM) -------
    x_tile_bytes = tm * in_features * x_item
    out_tile_bytes = tm * OUT_PAD * 4
    inter_bytes = 3 * tm * LANE * 4                       # f32 h1/h2/acc temporaries
    est = 2 * (x_tile_bytes + out_tile_bytes) + 2 * weight_bytes + inter_bytes
    vmem_limit = int(min(max(2 * est, 8 << 20), 48 << 20))

    resident = lambda a: pl.BlockSpec(a.shape, lambda i: (0, 0))  # stays in VMEM

    out_p = pl.pallas_call(
        mlp_kernel,
        out_shape=jax.ShapeDtypeStruct((batch, OUT_PAD), jnp.float32),
        grid=grid,
        in_specs=[
            pl.BlockSpec((tm, in_features), lambda i: (i, 0)),  # x: batch-tiled, raw dtype
            resident(w1_p),
            resident(b1_p),
            resident(w2_p),
            resident(b2_p),
            resident(w3_p),
            resident(b3_p),
        ],
        out_specs=pl.BlockSpec((tm, OUT_PAD), lambda i: (i, 0)),
        compiler_params=pltpu.CompilerParams(
            dimension_semantics=("parallel",),            # megacore sharding on v7x
            vmem_limit_bytes=vmem_limit,
        ),
        cost_estimate=cost,
    )(x, w1_p, b1_p, w2_p, b2_p, w3_p, b3_p)

    # Slice off the 6 zero output columns (cheap: 8 -> 2 lanes).
    return out_p[:, :OUT]


def init_linear(key, in_dim, out_dim):
    # Mimics torch.nn.Linear default init: U(-1/sqrt(fan_in), 1/sqrt(fan_in)).
    kw, kb = jax.random.split(key)
    bound = 1.0 / jnp.sqrt(jnp.float32(in_dim))
    w = jax.random.uniform(kw, (in_dim, out_dim), jnp.float32, -bound, bound)
    b = jax.random.uniform(kb, (1, out_dim), jnp.float32, -bound, bound)
    return w, b


def reference_mlp(x, w1, b1, w2, b2, w3, b3):
    h1 = jnp.maximum(x @ w1 + b1, 0.0)
    h2 = jnp.maximum(h1 @ w2 + b2, 0.0)
    return h2 @ w3 + b3


if __name__ == "__main__":
    key = jax.random.PRNGKey(0)
    k_x, k1, k2, k3 = jax.random.split(key, 4)

    in_features = 16
    w1, b1 = init_linear(k1, in_features, 64)
    w2, b2 = init_linear(k2, 64, 32)
    w3, b3 = init_linear(k3, 32, 2)

    # Small batch (not a multiple of 8): exercises the ragged last tile.
    batch = 10
    x = jax.random.normal(k_x, (batch, in_features), jnp.float32)
    ref = reference_mlp(x, w1, b1, w2, b2, w3, b3)

    out_f32 = jax.block_until_ready(
        mlp_forward(x, w1, b1, w2, b2, w3, b3, use_bf16=False))
    assert out_f32.shape == (batch, 2)
    assert jnp.allclose(out_f32, ref, atol=1e-5, rtol=1e-5)

    out_bf16 = jax.block_until_ready(
        mlp_forward(x, w1, b1, w2, b2, w3, b3, use_bf16=True))
    assert out_bf16.shape == (batch, 2)
    assert jnp.allclose(out_bf16, ref, atol=5e-2, rtol=5e-2)

    # Mid-size batch: exercises multi-step grid (>=2 tiles) + ragged last tile.
    batch2 = 200
    x2 = jax.random.normal(k_x, (batch2, in_features), jnp.float32)
    ref2 = reference_mlp(x2, w1, b1, w2, b2, w3, b3)
    out2 = jax.block_until_ready(
        mlp_forward(x2, w1, b1, w2, b2, w3, b3, use_bf16=False))
    assert out2.shape == (batch2, 2)
    assert jnp.allclose(out2, ref2, atol=1e-5, rtol=1e-5)

    print("KERNEL_OK")
</pallas_src>

<mosaic_0001>
module attributes {stable_mosaic.version = 11 : i64} {
  func.func @mlp_kernel(%arg0: i32, %arg1: memref<8x16xf32, #tpu.memory_space<vmem>>, %arg2: memref<16x128xf32, #tpu.memory_space<vmem>>, %arg3: memref<1x128xf32, #tpu.memory_space<vmem>>, %arg4: memref<128x128xf32, #tpu.memory_space<vmem>>, %arg5: memref<1x128xf32, #tpu.memory_space<vmem>>, %arg6: memref<128x8xf32, #tpu.memory_space<vmem>>, %arg7: memref<1x8xf32, #tpu.memory_space<vmem>>, %arg8: memref<8x8xf32, #tpu.memory_space<vmem>>) attributes {dimension_semantics = [#tpu.dimension_semantics<parallel>], iteration_bounds = array<i64: 2>, scalar_prefetch = 0 : i64, scratch_operands = 0 : i64, tpu.core_type = #tpu.core_type<tc>, window_params = [{transform_indices = @transform_0, window_bounds = array<i64: 8, 16>}, {pipeline_mode = #tpu.pipeline_mode<synchronous>, transform_indices = @transform_1, window_bounds = array<i64: 16, 128>}, {pipeline_mode = #tpu.pipeline_mode<synchronous>, transform_indices = @transform_2, window_bounds = array<i64: 1, 128>}, {pipeline_mode = #tpu.pipeline_mode<synchronous>, transform_indices = @transform_3, window_bounds = array<i64: 128, 128>}, {pipeline_mode = #tpu.pipeline_mode<synchronous>, transform_indices = @transform_4, window_bounds = array<i64: 1, 128>}, {pipeline_mode = #tpu.pipeline_mode<synchronous>, transform_indices = @transform_5, window_bounds = array<i64: 128, 8>}, {pipeline_mode = #tpu.pipeline_mode<synchronous>, transform_indices = @transform_6, window_bounds = array<i64: 1, 8>}, {transform_indices = @transform_7, window_bounds = array<i64: 8, 8>}]} {
    %c0 = arith.constant 0 : index
    %c0_0 = arith.constant 0 : index
    %0 = vector.load %arg1[%c0, %c0_0] : memref<8x16xf32, #tpu.memory_space<vmem>>, vector<8x16xf32>
    %c0_1 = arith.constant 0 : index
    %c0_2 = arith.constant 0 : index
    %1 = vector.load %arg2[%c0_1, %c0_2] : memref<16x128xf32, #tpu.memory_space<vmem>>, vector<16x128xf32>
    %cst = arith.constant dense<0.000000e+00> : vector<8x128xf32>
    %2 = tpu.matmul %0, %1, %cst {dimension_numbers = #tpu.dot_dimension_numbers<[1], [0], [0], [1], [0, 0, 1, 1], [], []>} : vector<8x16xf32>, vector<16x128xf32>, vector<8x128xf32> -> vector<8x128xf32>
    %c0_3 = arith.constant 0 : index
    %c0_4 = arith.constant 0 : index
    %3 = vector.load %arg3[%c0_3, %c0_4] : memref<1x128xf32, #tpu.memory_space<vmem>>, vector<1x128xf32>
    %4 = vector.broadcast %3 : vector<1x128xf32> to vector<8x128xf32>
    %5 = arith.addf %2, %4 : vector<8x128xf32>
    %cst_5 = arith.constant 0.000000e+00 : f32
    %6 = vector.broadcast %cst_5 : f32 to vector<8x128xf32>
    %7 = arith.maximumf %5, %6 : vector<8x128xf32>
    %c0_6 = arith.constant 0 : index
    %c0_7 = arith.constant 0 : index
    %8 = vector.load %arg4[%c0_6, %c0_7] : memref<128x128xf32, #tpu.memory_space<vmem>>, vector<128x128xf32>
    %cst_8 = arith.constant dense<0.000000e+00> : vector<8x128xf32>
    %9 = tpu.matmul %7, %8, %cst_8 {dimension_numbers = #tpu.dot_dimension_numbers<[1], [0], [0], [1], [0, 0, 1, 1], [], []>} : vector<8x128xf32>, vector<128x128xf32>, vector<8x128xf32> -> vector<8x128xf32>
    %c0_9 = arith.constant 0 : index
    %c0_10 = arith.constant 0 : index
    %10 = vector.load %arg5[%c0_9, %c0_10] : memref<1x128xf32, #tpu.memory_space<vmem>>, vector<1x128xf32>
    %11 = vector.broadcast %10 : vector<1x128xf32> to vector<8x128xf32>
    %12 = arith.addf %9, %11 : vector<8x128xf32>
    %cst_11 = arith.constant 0.000000e+00 : f32
    %13 = vector.broadcast %cst_11 : f32 to vector<8x128xf32>
    %14 = arith.maximumf %12, %13 : vector<8x128xf32>
    %c0_12 = arith.constant 0 : index
    %c0_13 = arith.constant 0 : index
    %15 = vector.load %arg6[%c0_12, %c0_13] : memref<128x8xf32, #tpu.memory_space<vmem>>, vector<128x8xf32>
    %cst_14 = arith.constant dense<0.000000e+00> : vector<8x8xf32>
    %16 = tpu.matmul %14, %15, %cst_14 {dimension_numbers = #tpu.dot_dimension_numbers<[1], [0], [0], [1], [0, 0, 1, 1], [], []>} : vector<8x128xf32>, vector<128x8xf32>, vector<8x8xf32> -> vector<8x8xf32>
    %c0_15 = arith.constant 0 : index
    %c0_16 = arith.constant 0 : index
    %17 = vector.load %arg7[%c0_15, %c0_16] : memref<1x8xf32, #tpu.memory_space<vmem>>, vector<1x8xf32>
    %18 = vector.broadcast %17 : vector<1x8xf32> to vector<8x8xf32>
    %19 = arith.addf %16, %18 : vector<8x8xf32>
    %c0_17 = arith.constant 0 : index
    %c0_18 = arith.constant 0 : index
    %20 = vector.load %arg8[%c0_17, %c0_18] : memref<8x8xf32, #tpu.memory_space<vmem>>, vector<8x8xf32>
    tpu.vector_store %arg8[%c0_17, %c0_18], %19 {strides = array<i32>} : memref<8x8xf32, #tpu.memory_space<vmem>>, vector<8x8xf32>,
    return
  }
  func.func @transform_0(%arg0: i32) -> (i32, i32) {
    %c0_i32 = arith.constant 0 : i32
    %c0_i32_0 = arith.constant 0 : i32
    return %arg0, %c0_i32 : i32, i32
  }
  func.func @transform_1(%arg0: i32) -> (i32, i32) {
    %c0_i32 = arith.constant 0 : i32
    %c0_i32_0 = arith.constant 0 : i32
    %c0_i32_1 = arith.constant 0 : i32
    return %c0_i32, %c0_i32_0 : i32, i32
  }
  func.func @transform_2(%arg0: i32) -> (i32, i32) {
    %c0_i32 = arith.constant 0 : i32
    %c0_i32_0 = arith.constant 0 : i32
    %c0_i32_1 = arith.constant 0 : i32
    return %c0_i32, %c0_i32_0 : i32, i32
  }
  func.func @transform_3(%arg0: i32) -> (i32, i32) {
    %c0_i32 = arith.constant 0 : i32
    %c0_i32_0 = arith.constant 0 : i32
    %c0_i32_1 = arith.constant 0 : i32
    return %c0_i32, %c0_i32_0 : i32, i32
  }
  func.func @transform_4(%arg0: i32) -> (i32, i32) {
    %c0_i32 = arith.constant 0 : i32
    %c0_i32_0 = arith.constant 0 : i32
    %c0_i32_1 = arith.constant 0 : i32
    return %c0_i32, %c0_i32_0 : i32, i32
  }
  func.func @transform_5(%arg0: i32) -> (i32, i32) {
    %c0_i32 = arith.constant 0 : i32
    %c0_i32_0 = arith.constant 0 : i32
    %c0_i32_1 = arith.constant 0 : i32
    return %c0_i32, %c0_i32_0 : i32, i32
  }
  func.func @transform_6(%arg0: i32) -> (i32, i32) {
    %c0_i32 = arith.constant 0 : i32
    %c0_i32_0 = arith.constant 0 : i32
    %c0_i32_1 = arith.constant 0 : i32
    return %c0_i32, %c0_i32_0 : i32, i32
  }
  func.func @transform_7(%arg0: i32) -> (i32, i32) {
    %c0_i32 = arith.constant 0 : i32
    %c0_i32_0 = arith.constant 0 : i32
    return %arg0, %c0_i32 : i32, i32
  }
}

</mosaic_0001>

<bundles_post_ra>
// kernel: mlp_forward.1
= control target key start
LH: loop header
LB: loop body
LE: loop exit
PB: predicated region body
PF: predicated region fallthrough
CT: control target
= control target key end

     0   :  { %s511_s24 = smov 0   ;;  %s646_s0 = inlined_call_operand.vmem [shape: f32[10,16], index: 0, kind: input, shape index: {}]   ;;  %s647_s1 = inlined_call_operand.vmem [shape: f32[16,128], index: 1, kind: input, shape index: {}]   ;;  %s648_s2 = inlined_call_operand.vmem [shape: f32[1,128], index: 2, kind: input, shape index: {}]   ;;  %s649_s3 = inlined_call_operand.vmem [shape: f32[128,128], index: 3, kind: input, shape index: {}]   ;;  %s650_s4 = inlined_call_operand.vmem [shape: f32[1,128], index: 4, kind: input, shape index: {}]   ;;  %s651_s5 = inlined_call_operand.vmem [shape: f32[128,8], index: 5, kind: input, shape index: {}]   ;;  %s652_s6 = inlined_call_operand.vmem [shape: f32[1,8], index: 6, kind: input, shape index: {}]   ;;  %s653_s7 = inlined_call_operand.vmem [shape: f32[10,8], index: 7, kind: output, shape index: {}]  }
   0x1 LB: > { %s442_s25 = sadd.s32 4294967295, %s469_s24   ;;  %p446_p0 = scmp.ge.s32.totalorder %s469_s24, 1  ;;  %s469_s24 = sphi %s511_s24, %s17_s24  }
   0x2   : > { %p236_p1 = scmp.lt.s32.totalorder %s469_s24, 3 }
   0x4   : > { %p237_p2 = pnand %p446_p0, %p236_p1 }
   0x5   : > { %p266_p3 = scmp.lt.s32.totalorder (!%p237_p2), %s442_s25, 1 }
   0x6   : > { %240 = sbr.rel (%p237_p2) target bundleno = 410 (0x19a), region = 48 }
   0xb   : > { %v276_v0 = vld [vmem:[%s647_s1 + $0x8] sm:$0xff]  ;;  %v275_v1 = vld [vmem:[%s647_s1] sm:$0xff]  ;;  %v321_v2 = vld [vmem:[%s649_s3 + $0x78] sm:$0xff]  ;;  %s655_s25 = smov (!%p266_p3, %s442_s25), 1  ;;  %vm281_vm0 = vcmask 130048   ;;  %vm387_vm1 = vcmask 64512  }
   0xc   : > { %299 = vmatpush.msra.mxu0 %v276_v0  ;;  %326 = vmatpush.msra.mxu1 %v321_v2  ;;  %v320_v3 = vld [vmem:[%s649_s3 + $0x70] sm:$0xff]  ;;  %v319_v4 = vld [vmem:[%s649_s3 + $0x68] sm:$0xff]  ;;  %s447_s13 = sshll.u32 %s655_s25, 3  ;;  %v318_v5 = vld [vmem:[%s649_s3 + $0x60] sm:$0xff] }
   0xd   : > { %s269_s18 = scalar_lea.vmem %s646_s0, %s447_s13  ;;  %v317_v7 = vld [vmem:[%s649_s3 + $0x58] sm:$0xff]  ;;  %v316_v8 = vld [vmem:[%s649_s3 + $0x50] sm:$0xff]  ;;  %v315_v9 = vld [vmem:[%s649_s3 + $0x48] sm:$0xff]  ;;  %s273_s23 = scalar_lea.vmem %s653_s7, %s447_s13 }
   0xe   : > { %300 = vmatpush.msra.mxu0 %v275_v1  ;;  %327 = vmatpush.msra.mxu1 %v320_v3  ;;  %v274_v6 = vld [vmem:[%s269_s18] sm:$0xff]  ;;  %v313_v11 = vld [vmem:[%s649_s3 + $0x38] sm:$0xff]  ;;  %v312_v12 = vld [vmem:[%s649_s3 + $0x30] sm:$0xff] }
   0xf   : > { %449 = vmatmul.msk.f32.vlgmr.msra.gmra.mxu0 %vm281_vm0, %v274_v6  ;;  %v314_v10 = vld [vmem:[%s649_s3 + $0x40] sm:$0xff]  ;;  %v311_v13 = vld [vmem:[%s649_s3 + $0x28] sm:$0xff]  ;;  %v309_v15 = vld [vmem:[%s649_s3 + $0x18] sm:$0xff] }
  0x10   : > { %328 = vmatpush.msra.mxu1 %v319_v4  ;;  %v310_v14 = vld [vmem:[%s649_s3 + $0x20] sm:$0xff]  ;;  %v308_v16 = vld [vmem:[%s649_s3 + $0x10] sm:$0xff]  ;;  %v307_v17 = vld [vmem:[%s649_s3 + $0x8] sm:$0xff] }
  0x11   : > { %v306_v18 = vld [vmem:[%s649_s3] sm:$0xff]  ;;  %v362_v19 = vld [vmem:[%s651_s5 + $0x78] sm:$0xff]  ;;  %v361_v20 = vld [vmem:[%s651_s5 + $0x70] sm:$0xff] }
  0x12   : > { %329 = vmatpush.msra.mxu1 %v318_v5  ;;  %367 = vmatpush.msra.mxu2 %v362_v19  ;;  %v360_v21 = vld [vmem:[%s651_s5 + $0x68] sm:$0xff]  ;;  %v359_v22 = vld [vmem:[%s651_s5 + $0x60] sm:$0xff]  ;;  %v358_v23 = vld [vmem:[%s651_s5 + $0x58] sm:$0xff] }
  0x13   : > { %v357_v24 = vld [vmem:[%s651_s5 + $0x50] sm:$0xff]  ;;  %v356_v25 = vld [vmem:[%s651_s5 + $0x48] sm:$0xff]  ;;  %v355_v26 = vld [vmem:[%s651_s5 + $0x40] sm:$0xff] }
  0x14   : > { %330 = vmatpush.msra.mxu1 %v317_v7  ;;  %368 = vmatpush.msra.mxu2 %v361_v20  ;;  %v354_v27 = vld [vmem:[%s651_s5 + $0x38] sm:$0xff]  ;;  %v353_v28 = vld [vmem:[%s651_s5 + $0x30] sm:$0xff]  ;;  %v352_v29 = vld [vmem:[%s651_s5 + $0x28] sm:$0xff] }
  0x15   : > { %v351_v30 = vld [vmem:[%s651_s5 + $0x20] sm:$0xff]  ;;  %v350_v31 = vld [vmem:[%s651_s5 + $0x18] sm:$0xff]  ;;  %v349_v36 = vld [vmem:[%s651_s5 + $0x10] sm:$0xff] }
  0x16   : > { %331 = vmatpush.msra.mxu1 %v316_v8  ;;  %369 = vmatpush.msra.mxu2 %v360_v21  ;;  %v460_v32 = vld [vmem:[%s648_s2] ss:$0 sm:$0xff]  ;;  %v348_v37 = vld [vmem:[%s651_s5 + $0x8] sm:$0xff] }
  0x17   : > { %v347_v38 = vld [vmem:[%s651_s5] sm:$0xff] }
  0x18   : > { %332 = vmatpush.msra.mxu1 %v315_v9  ;;  %370 = vmatpush.msra.mxu2 %v359_v22  ;;  %v461_v39 = vld [vmem:[%s650_s4] ss:$0 sm:$0xff] }
  0x19   : > { %v462_v43 = vld [vmem:[%s652_s6] ss:$0 sm:$0xff] }
  0x1a   : > { %333 = vmatpush.msra.mxu1 %v314_v10  ;;  %371 = vmatpush.msra.mxu2 %v358_v23 }
  0x1c   : > { %334 = vmatpush.msra.mxu1 %v313_v11  ;;  %372 = vmatpush.msra.mxu2 %v357_v24 }
  0x1e   : > { %335 = vmatpush.msra.mxu1 %v312_v12  ;;  %373 = vmatpush.msra.mxu2 %v356_v25 }
  0x20   : > { %336 = vmatpush.msra.mxu1 %v311_v13  ;;  %374 = vmatpush.msra.mxu2 %v355_v26 }
  0x22   : > { %337 = vmatpush.msra.mxu1 %v310_v14  ;;  %375 = vmatpush.msra.mxu2 %v354_v27 }
  0x24   : > { %338 = vmatpush.msra.mxu1 %v309_v15  ;;  %376 = vmatpush.msra.mxu2 %v353_v28 }
  0x26   : > { %339 = vmatpush.msra.mxu1 %v308_v16  ;;  %377 = vmatpush.msra.mxu2 %v352_v29 }
  0x28   : > { %340 = vmatpush.msra.mxu1 %v307_v17  ;;  %378 = vmatpush.msra.mxu2 %v351_v30 }
  0x2a   : > { %341 = vmatpush.msra.mxu1 %v306_v18  ;;  %379 = vmatpush.msra.mxu2 %v350_v31 }
  0x2c   : > { %380 = vmatpush.msra.mxu2 %v349_v36 }
  0x2e   : > { %381 = vmatpush.msra.mxu2 %v348_v37 }
  0x30   : > { %382 = vmatpush.msra.mxu2 %v347_v38 }
  0x8c   : > { %v302_v33 = vpop.f32.mrf.mxu0 }
  0x8d   : > { %v303_v34 = vadd.f32 %v460_v32, %v302_v33 }
  0x8f   : > { %v305_v35 = vmax.f32 %v303_v34, 0.0 }
  0x91   : > { %342 = vmatmul.f32.vlgmr.msra.gmra.mxu1 %v305_v35 }
 0x10e   : > { %v343_v40 = vpop.f32.mrf.mxu1 }
 0x10f   : > { %v344_v41 = vadd.f32 %v461_v39, %v343_v40 }
 0x111   : > { %v346_v42 = vmax.f32 %v344_v41, 0.0 }
 0x113   : > { %383 = vmatmul.f32.vlgmr.msra.gmra.mxu2 %v346_v42 }
 0x196   : > { %v384_v44 = vpop.f32.mrf.mxu2 }
 0x197   : > { %v385_v45 = vadd.f32 %v462_v43, %v384_v44 }
 0x199   : > { %388 = vst.msk [vmem:[%s273_s23] sm:$0xff] %vm387_vm1, %v385_v45 }
 0x19a PF: > { %s17_s24 = sadd.s32 1, %s469_s24  }
 0x19b   : > { %p14_p4 = scmp.ge.s32.totalorder %s17_s24, 4  }
 0x19d   :  { %16 = sbr.rel (!%p14_p4) target bundleno = 1 (0x1), region = 78 }

</bundles_post_ra>
